<compile_context>
chip_gen: v7x
topology: tpu7x:2x2x1
jax: 0.10.0
libtpu: 0.0.40
codegen_flags: <defaults>
</compile_context>

<pallas_src>
import jax
import jax.numpy as jnp
from jax.experimental import pallas as pl
from jax.experimental.pallas import tpu as pltpu

_LANE = 128
_SUBLANE = 8
_TM_CAP = 4096  # rows/block -> 4096*128*4B = 2 MiB per f32 operand block


def _bcast_add_kernel(x_ref, x1_ref, o_ref):
    # x_ref : (1, TM, 128) streaming tile of batch i
    # x1_ref: (1, TM, 128) matching tile of the broadcast operand x[1]
    #         (block index is constant across the inner batch axis, so the
    #          auto-pipeliner fetches it only once per row tile)
    o_ref[...] = x1_ref[...] + x_ref[...]


def model_forward(x, y=None, z=None):
    # y, z are unused by the (broken) reference forward.
    del y, z
    N, C, H, W = x.shape
    assert N >= 2, "reference forward slices x[1:2]; need batch >= 2"

    chw = C * H * W

    # Lane-dense flattening: (N, C, H, W) -> (N, m_total, 128). Zero-copy
    # reshape when chw is lane-aligned (the usual case); pad fallback else.
    pad = (-chw) % _LANE
    xf = x.reshape(N, chw)
    if pad:
        # TODO(synk): ragged tail (<128 elems/batch) falls back to a padded
        # copy; a tiny epilogue add would avoid the extra HBM pass.
        xf = jnp.pad(xf, ((0, 0), (0, pad)))
    m_total = (chw + pad) // _LANE
    xf = xf.reshape(N, m_total, _LANE)

    # Row-tile size: always a multiple of 8 sublanes when m_total >= 8 (a
    # partial last block is legal and masked for this elementwise op), so the
    # block never balloons to the whole row axis on unaligned shapes.
    if m_total >= _SUBLANE:
        tm = min(m_total, _TM_CAP)
        tm = (tm // _SUBLANE) * _SUBLANE
    else:
        tm = m_total  # < 8 rows: full extent is the only legal block
    grid_m = pl.cdiv(m_total, tm)

    block = (1, tm, _LANE)
    # Grid = (row-tiles, batch): batch innermost so the broadcast operand's
    # block index (1, j, 0) is unchanged across consecutive steps and its DMA
    # is elided after the first batch of each row tile.
    out_flat = pl.pallas_call(
        _bcast_add_kernel,
        out_shape=jax.ShapeDtypeStruct((N, m_total, _LANE), x.dtype),
        grid_spec=pltpu.PrefetchScalarGridSpec(
            num_scalar_prefetch=0,
            grid=(grid_m, N),
            in_specs=[
                pl.BlockSpec(block, lambda j, i: (i, j, 0)),  # streaming x[i]
                pl.BlockSpec(block, lambda j, i: (1, j, 0)),  # x[1] (v4)
            ],
            out_specs=pl.BlockSpec(block, lambda j, i: (i, j, 0)),
        ),
        compiler_params=pltpu.CompilerParams(
            dimension_semantics=("parallel", "parallel"),
            vmem_limit_bytes=32 * 1024 * 1024,
        ),
    )(xf, xf)

    out = out_flat
    if pad:
        out = out.reshape(N, m_total * _LANE)[:, :chw]
    return out.reshape(N, C, H, W)


if __name__ == "__main__":
    key = jax.random.PRNGKey(0)
    kx, ky, kz = jax.random.split(key, 3)

    # Small NCHW shapes consistent with the module (batch >= 2 so x[1:2] is
    # non-empty, as the reference forward requires).
    N, C, H, W = 2, 4, 16, 16
    x = jax.random.normal(kx, (N, C, H, W), dtype=jnp.float32)
    y = jax.random.normal(ky, (N, C, H, W), dtype=jnp.float32)  # unused
    z = jax.random.normal(kz, (N, C, H, W), dtype=jnp.float32)  # unused

    out = model_forward(x, y, z)
    out = jax.block_until_ready(out)

    # Pure-JAX reference of the interpreted semantics.
    ref = x[1:2] + x
    assert out.shape == (N, C, H, W)
    assert jnp.allclose(out, ref, atol=1e-6, rtol=1e-6)

    print("KERNEL_OK")
</pallas_src>

<mosaic_0001>
module attributes {stable_mosaic.version = 11 : i64} {
  func.func @_bcast_add_kernel(%arg0: i32, %arg1: i32, %arg2: memref<1x8x128xf32, #tpu.memory_space<vmem>>, %arg3: memref<1x8x128xf32, #tpu.memory_space<vmem>>, %arg4: memref<1x8x128xf32, #tpu.memory_space<vmem>>) attributes {dimension_semantics = [#tpu.dimension_semantics<parallel>, #tpu.dimension_semantics<parallel>], iteration_bounds = array<i64: 1, 2>, scalar_prefetch = 0 : i64, scratch_operands = 0 : i64, tpu.core_type = #tpu.core_type<tc>, window_params = [{transform_indices = @transform_0, window_bounds = array<i64: 1, 8, 128>}, {transform_indices = @transform_1, window_bounds = array<i64: 1, 8, 128>}, {transform_indices = @transform_2, window_bounds = array<i64: 1, 8, 128>}]} {
    %c0 = arith.constant 0 : index
    %c0_0 = arith.constant 0 : index
    %c0_1 = arith.constant 0 : index
    %0 = vector.load %arg3[%c0, %c0_0, %c0_1] : memref<1x8x128xf32, #tpu.memory_space<vmem>>, vector<1x8x128xf32>
    %c0_2 = arith.constant 0 : index
    %c0_3 = arith.constant 0 : index
    %c0_4 = arith.constant 0 : index
    %1 = vector.load %arg2[%c0_2, %c0_3, %c0_4] : memref<1x8x128xf32, #tpu.memory_space<vmem>>, vector<1x8x128xf32>
    %2 = arith.addf %0, %1 : vector<1x8x128xf32>
    %c0_5 = arith.constant 0 : index
    %c0_6 = arith.constant 0 : index
    %c0_7 = arith.constant 0 : index
    %3 = vector.load %arg4[%c0_5, %c0_6, %c0_7] : memref<1x8x128xf32, #tpu.memory_space<vmem>>, vector<1x8x128xf32>
    tpu.vector_store %arg4[%c0_5, %c0_6, %c0_7], %2 {strides = array<i32>} : memref<1x8x128xf32, #tpu.memory_space<vmem>>, vector<1x8x128xf32>,
    return
  }
  func.func @transform_0(%arg0: i32, %arg1: i32) -> (i32, i32, i32) {
    %c0_i32 = arith.constant 0 : i32
    %c0_i32_0 = arith.constant 0 : i32
    return %arg1, %arg0, %c0_i32 : i32, i32, i32
  }
  func.func @transform_1(%arg0: i32, %arg1: i32) -> (i32, i32, i32) {
    %c1_i32 = arith.constant 1 : i32
    %c0_i32 = arith.constant 0 : i32
    %c0_i32_0 = arith.constant 0 : i32
    return %c1_i32, %arg0, %c0_i32 : i32, i32, i32
  }
  func.func @transform_2(%arg0: i32, %arg1: i32) -> (i32, i32, i32) {
    %c0_i32 = arith.constant 0 : i32
    %c0_i32_0 = arith.constant 0 : i32
    return %arg1, %arg0, %c0_i32 : i32, i32, i32
  }
}

</mosaic_0001>

<bundles_post_ra>
// kernel: tpu_custom_call.1
= control target key start
LH: loop header
LB: loop body
LE: loop exit
PB: predicated region body
PF: predicated region fallthrough
CT: control target
= control target key end

     0   :  { %7 = vsyncpa [#allocation3], 0  ;;  %s781_s0 = inlined_call_operand.hbm [shape: f32[2,8,128], index: 0, kind: input, shape index: {}]   ;;  %s782_s1 = inlined_call_operand.hbm [shape: f32[2,8,128], index: 1, kind: input, shape index: {}]   ;;  %s783_s2 = inlined_call_operand.hbm [shape: f32[2,8,128], index: 2, kind: output, shape index: {}]  }
   0x1   :  { %9 = vsyncpa [#allocation3 + $0x1], 0 }
   0x2   :  { %10 = vsyncpa [#allocation6], 0 }
   0x3   :  { %11 = vsyncpa [#allocation4], 0 }
   0x4   :  { %13 = vsyncpa [#allocation4 + $0x1], 0  ;;  %s564_s9 = smov 0   ;;  %s566_s10 = smov 0  }
   0x5   :  { %s568_s11 = smov 0   ;;  %s570_s12 = smov 0  }
   0x6   :  { %s572_s13 = smov 0   ;;  %s574_s14 = smov 0  }
   0x7 LB: > { %s309_s15 = sadd.s32 4294967295, %s544_s14   ;;  %s310_s16 = sadd.s32 4294967294, %s544_s14   ;;  %s544_s14 = sphi %s574_s14, %s19_s14   ;;  %s540_s13 = sphi %s572_s13, %s810_s13   ;;  %s536_s12 = sphi %s570_s12, %s809_s12   ;;  %s532_s11 = sphi %s568_s11, %s808_s11   ;;  %s528_s10 = sphi %s566_s10, %s807_s10   ;;  %s524_s9 = sphi %s564_s9, %s806_s9  }
   0x8   : > { %p53_p0 = scmp.ne.s32.totalorder %s528_s10, %s524_s9  ;;  %p598_p1 = scmp.eq.s32.totalorder %s309_s15, 0 }
   0x9   : > { %p602_p2 = scmp.eq.s32.totalorder %s309_s15, 1  ;;  %p111_p3 = scmp.eq.s32.totalorder %s310_s16, 1 }
   0xa   : > { %s789_s17 = scalar_select %p598_p1, 1, 0 }
   0xb   : > { %s790_s18 = scalar_select %p602_p2, 1, 0 }
   0xc   : > { %p608_p4 = por %p598_p1, %p53_p0  ;;  %p311_p5 = scmp.ge.s32.totalorder %s544_s14, 1 }
   0xd   : > { %p613_p6 = por %p111_p3, %p53_p0  ;;  %p118_p7 = scmp.lt.s32.totalorder %s544_s14, 3 }
   0xe   : > { %s791_s19 = scalar_select %p608_p4, 1, 0 }
   0xf   : > { %s792_s20 = scalar_select %p613_p6, 1, 0 }
  0x10   : > { %s621_s23 = scalar_lea.hbm %s782_s1, 128  ;;  %p623_p8 = pnand %p311_p5, %p118_p7 }
  0x11   : > { %s546_s25 = smov [#allocation5]   ;;  %s28_s28 = sadd.s32 1, %s540_s13 }
  0x12   : > { %s793_s24 = scalar_select %p623_p8, 1, 0 }
  0x13   : > { %s134_s26 = sshll.u32 %s546_s25, 4  ;;  %p332_p10 = pneg %p623_p8  ;;  %s135_s26 = int_to_ptr.vmem [resolvable:$true] %s134_s26 }
  0x14   : > { %p637_p12 = scmp.ge.s32.totalorder %s28_s28, 2  ;;  %s427_s4 = scalar_lea.hbm %s782_s1, 256 }
  0x15   : > { %p632_p11 = pnand %p332_p10, %p598_p1  ;;  %p398_p13 = scmp.ne.s32.totalorder %s621_s23, %s427_s4 }
  0x16   : > { %s795_s29 = scalar_select %p637_p12, 1, 0 }
  0x17   : > { %s794_s27 = scalar_select %p632_p11, 1, 0 }
  0x18   : > { %p399_p0 = pneg %p632_p11  ;;  %p403_p7 = scmp.lt.u32.totalorder %s621_s23, %s782_s1 }
  0x19   : > { %p404_p10 = scmp.lt.u32.totalorder %s427_s4, %s427_s4  ;;  %p406_p6 = scmp.lt.u32.totalorder %s427_s4, %s621_s23 }
  0x1a   : > { %p400_p3 = pnand %p399_p0, %p398_p13 }
  0x1b   : > { %p405_p9 = por %p404_p10, %p403_p7 }
  0x1c   : > { %p401_p5 = pneg %p400_p3 }
  0x1d   : > { %p407_p1 = por %p406_p6, %p405_p9 }
  0x1f   : > { %p408_p4 = pnand %p407_p1, %p401_p5 }
  0x21   : > { %411 = shalt.err (!%p408_p4)
}
  0x22   : > { %s412_s7 = scalar_lea.vmem %s135_s26, 128  ;;  %p420_p11 = scmp.lt.s32.totalorder %s135_s26, %s135_s26 }
  0x23   : > { %p413_p8 = scmp.ne.s32.totalorder %s135_s26, %s412_s7  ;;  %p421_p13 = scmp.lt.s32.totalorder %s412_s7, %s412_s7 }
  0x25   : > { %p415_p2 = pnand %p413_p8, %p399_p0  ;;  %p422_p3 = por %p421_p13, %p420_p11 }
  0x27   : > { %p416_p12 = pneg %p415_p2 }
  0x29   : > { %p423_p7 = pnand %p422_p3, %p416_p12 }
  0x2b   : > { %426 = shalt.err (!%p423_p7)
}
  0x2c   : > { %p796_p10 = scmp.ne.s32.totalorder %s794_s27, 0  ;;  %p797_p1 = scmp.ne.s32.totalorder %s795_s29, 0 }
  0x2d   : > { %s40_s8 = sadd.s32 1, %s532_s11  ;;  %p47_p2 = scmp.ne.s32.totalorder %s532_s11, %s528_s10 }
  0x2e   : > { %335 = dma.hbm_to_vmem [thread:$0]  (!%p796_p10), %s621_s23, 128, %s135_s26, [#allocation6]  }
  0x2f   : > { %s812_s28 = smov (%p797_p1, %s28_s28), 0  ;;  %p48_p4 = scmp.eq.s32.totalorder %s544_s14, 0 }
  0x30   : > { %s35_s15 = ssub.s32 %s540_s13, %s812_s28  ;;  %p798_p8 = scmp.ne.s32.totalorder %s790_s18, 0 }
  0x31   : > { %p38_p6 = scmp.eq.s32.totalorder %s35_s15, 0  ;;  %p49_p11 = por %p48_p4, %p47_p2 }
  0x32   : > { %p667_p9 = por %p798_p8, %p47_p2  ;;  %p345_p12 = scmp.lt.s32.totalorder %s544_s14, 2 }
  0x33   : > { %s673_s21 = scalar_select %p38_p6, %s532_s11, %s40_s8  }
  0x34   : > { %s145_s22 = sand.u32 1, %s532_s11   ;;  %s315_s23 = sshll.u32 %s540_s13, 7 }
  0x35   : > { %s314_s25 = sshll.u32 %s145_s22, 3  ;;  %s680_s29 = scalar_lea.hbm %s781_s0, %s315_s23 }
  0x36   : > { %s149_s18 = scalar_lea.vmem [#allocation2], %s314_s25  ;;  %p682_p0 = pnand %p345_p12, %p49_p11 }
  0x37   : > { %s157_s30 = sshll.u32 %s149_s18, 4  ;;  %s146_s4 = scalar_lea.sflag [#allocation3], %s145_s22  ;;  %s686_s30 = int_to_ptr.vmem [resolvable:$true] %s157_s30 }
  0x38   : > { %s428_s5 = scalar_lea.hbm %s680_s29, 128  ;;  %p430_p13 = pneg %p682_p0 }
  0x39   : > { %p429_p5 = scmp.ne.s32.totalorder %s680_s29, %s428_s5  ;;  %s433_s8 = scalar_lea.hbm %s781_s0, 256 }
  0x3a   : > { %p434_p10 = scmp.lt.u32.totalorder %s680_s29, %s781_s0  ;;  %p435_p1 = scmp.lt.u32.totalorder %s433_s8, %s428_s5 }
  0x3b   : > { %p431_p3 = pnand %p430_p13, %p429_p5  ;;  %p437_p4 = scmp.lt.u32.totalorder %s428_s5, %s680_s29 }
  0x3c   : > { %p436_p2 = por %p435_p1, %p434_p10 }
  0x3d   : > { %p432_p7 = pneg %p431_p3 }
  0x3e   : > { %p438_p6 = por %p437_p4, %p436_p2 }
  0x40   : > { %p439_p8 = pnand %p438_p6, %p432_p7 }
  0x42   : > { %442 = shalt.err (!%p439_p8)
}
  0x43   : > { %s443_s22 = scalar_lea.vmem %s686_s30, 128  ;;  %s547_s25 = smov [#allocation2]  }
  0x44   : > { %p444_p11 = scmp.ne.s32.totalorder %s686_s30, %s443_s22  ;;  %s448_s26 = sshll.u32 %s547_s25, 4  ;;  %s449_s26 = int_to_ptr.vmem [resolvable:$false] %s448_s26 }
  0x45   : > { %s450_s27 = scalar_lea.vmem %s449_s26, 256  ;;  %p451_p3 = scmp.lt.s32.totalorder %s686_s30, %s449_s26 }
  0x46   : > { %p446_p12 = pnand %p444_p11, %p430_p13  ;;  %p452_p10 = scmp.lt.s32.totalorder %s450_s27, %s443_s22 }
  0x48   : > { %p447_p5 = pneg %p446_p12  ;;  %p453_p1 = por %p452_p10, %p451_p3 }
  0x4a   : > { %p454_p2 = pnand %p453_p1, %p447_p5 }
  0x4c   : > { %457 = shalt.err (!%p454_p2)
}
  0x4d   : > { %339 = dma.hbm_to_vmem [thread:$0]  (!%p682_p0), %s680_s29, 128, %s686_s30, %s146_s4  }
  0x4e   : > { %p801_p7 = scmp.ne.s32.totalorder %s793_s24, 0 }
  0x4f   : > { %s716_s18 = sand.u32 (!%p801_p7), 1, %s528_s10   ;;  %p802_p13 = scmp.ne.s32.totalorder (!%p801_p7), %s791_s19, 0 }
  0x50   : > { %166 = sbr.rel (%p801_p7) target bundleno = 116 (0x74), region = 28  ;;  %s317_s5 = sshll.u32 (!%p801_p7), %s716_s18, 3 }
  0x51   : > { %s169_s6 = scalar_lea.sflag (!%p801_p7), [#allocation3], %s716_s18  ;;  %s172_s7 = scalar_lea.vmem (!%p801_p7), [#allocation2], %s317_s5 }
  0x57   : > { %511 = dma.done.wait (%p802_p13), %s169_s6, 128  }
  0x58   : > { %513 = vsyncadd (%p802_p13), %s169_s6, 4294967168  ;;  %p803_p4 = scmp.ne.s32.totalorder %s789_s17, 0 }
  0x5a   : > { %515 = dma.done.wait (%p803_p4), [#allocation6], 128  }
  0x5b   : > { %517 = vsyncadd (%p803_p4), [#allocation6], 4294967168  ;;  %s196_s24 = scalar_lea.vmem [#allocation7], %s317_s5  ;;  %s321_s30 = sshll.u32 %s536_s12, 7  ;;  %v197_v0 = vld [vmem:[#allocation5] sm:$0xff]  ;;  %v198_v1 = vld [vmem:[%s172_s7] sm:$0xff] }
  0x5c   : > { %s216_s29 = sshll.u32 %s196_s24, 4  ;;  %v199_v2 = vadd.f32 %v198_v1, %v197_v0  ;;  %s734_s4 = scalar_lea.hbm %s783_s2, %s321_s30  ;;  %s729_s29 = int_to_ptr.vmem [resolvable:$true] %s216_s29 }
  0x5d   : > { %s202_s17 = scalar_lea.sflag [#allocation4], %s716_s18  ;;  %s458_s8 = scalar_lea.vmem %s729_s29, 128 }
  0x5e   : > { %200 = vst [vmem:[%s196_s24] sm:$0xff] %v199_v2  ;;  %p459_p0 = scmp.ne.s32.totalorder %s729_s29, %s458_s8  ;;  %s548_s12 = smov [#allocation7]  }
  0x5f   : > { %s462_s15 = sshll.u32 %s548_s12, 4  ;;  %s463_s15 = int_to_ptr.vmem [resolvable:$false] %s462_s15 }
  0x60   : > { %p460_p6 = pnand %p459_p0, %p667_p9  ;;  %s464_s23 = scalar_lea.vmem %s463_s15, 256 }
  0x61   : > { %p465_p11 = scmp.lt.s32.totalorder %s729_s29, %s463_s15  ;;  %p466_p12 = scmp.lt.s32.totalorder %s464_s23, %s458_s8 }
  0x62   : > { %p461_p8 = pneg %p460_p6 }
  0x63   : > { %p467_p5 = por %p466_p12, %p465_p11 }
  0x65   : > { %p468_p3 = pnand %p467_p5, %p461_p8 }
  0x67   : > { %471 = shalt.err (!%p468_p3)
}
  0x68   : > { %s472_s22 = scalar_lea.hbm %s734_s4, 128  ;;  %s476_s27 = scalar_lea.hbm %s783_s2, 256 }
  0x69   : > { %p473_p10 = scmp.ne.s32.totalorder %s734_s4, %s472_s22  ;;  %p477_p7 = scmp.lt.u32.totalorder %s734_s4, %s783_s2 }
  0x6a   : > { %p478_p13 = scmp.lt.u32.totalorder %s476_s27, %s472_s22  ;;  %p480_p0 = scmp.lt.u32.totalorder %s472_s22, %s734_s4 }
  0x6b   : > { %p474_p1 = pnand %p473_p10, %p667_p9 }
  0x6c   : > { %p479_p4 = por %p478_p13, %p477_p7 }
  0x6d   : > { %p475_p2 = pneg %p474_p1 }
  0x6e   : > { %p481_p6 = por %p480_p0, %p479_p4 }
  0x70   : > { %p482_p8 = pnand %p481_p6, %p475_p2 }
  0x72   : > { %485 = shalt.err (!%p482_p8)
}
  0x73   : > { %330 = dma.vmem_to_hbm [thread:$0]  (%p667_p9), %s729_s29, 128, %s734_s4, %s202_s17  }
  0x74 PF: > { %s228_s6 = sand.u32 1, %s524_s9   ;;  %p804_p11 = scmp.ne.s32.totalorder %s792_s20, 0 }
  0x75   : > { %p805_p12 = scmp.ge.s32.totalorder %s544_s14, 2  ;;  %s229_s7 = scalar_lea.sflag [#allocation4], %s228_s6 }
  0x77   : > { %p341_p5 = pnand %p805_p12, %p804_p11 }
  0x79   : > { %519 = dma.done.wait (!%p341_p5), %s229_s7, 128  }
  0x7a   : > { %521 = vsyncadd (!%p341_p5), %s229_s7, 4294967168  ;;  %s19_s14 = sadd.s32 1, %s544_s14   ;;  %s806_s9 = smov %s528_s10 }
  0x7b   : > { %p16_p3 = scmp.ge.s32.totalorder %s19_s14, 4   ;;  %s807_s10 = smov %s532_s11 }
  0x7c   : > { %s808_s11 = smov %s673_s21  ;;  %s809_s12 = smov %s540_s13 }
  0x7d   : > { %s810_s13 = smov %s812_s28  ;;  %18 = sbr.rel (!%p16_p3) target bundleno = 7 (0x7), region = 78 }
  0x84   :  { %234 = vsyncpa [#allocation3], 1 }
  0x85   :  { %236 = vsyncpa [#allocation3 + $0x1], 1 }
  0x86   :  { %237 = vsyncpa [#allocation6], 1 }
  0x87   :  { %238 = vsyncpa [#allocation4], 1 }
  0x88   :  { %240 = vsyncpa [#allocation4 + $0x1], 1 }

</bundles_post_ra>
